<compile_context>
chip_gen: v6e
topology: v6e:2x2x1
jax: 0.10.0
libtpu: 0.0.40
codegen_flags: <defaults>
</compile_context>

<pallas_src>
import functools

import jax
import jax.numpy as jnp
from jax.experimental import pallas as pl
from jax.experimental.pallas import tpu as pltpu  # noqa: F401  (TPU backend)


# Weight-slab row layout (every section starts on an 8-row tile boundary):
#   rows   0:4   w1   [4,128]
#   row    4     b1   [1,128]      (rows 5:8 zero padding)
#   rows   8:136 w2   [128,128]
#   row    136   b2   [1,128]      (rows 137:144 zero padding)
#   rows 144:272 w3   [128,128]    (columns >= A are zero)
#   row    272   b3   [1,128]      (columns >= A are zero; rows 273:280 zero padding)
SLAB_ROWS = 280


def qnet_kernel(x_ref, w_ref, o_ref):
    x = x_ref[...]                                                    # [B, 4]

    # Layer 1: [B,4] @ [4,128] + b1, ReLU.  The [1,128] bias add is a free VPU op.
    h1 = jnp.maximum(
        jnp.dot(x, w_ref[0:4, :], preferred_element_type=jnp.float32)
        + w_ref[4:5, :],
        0.0,
    )                                                                 # [B, 128]

    # Layer 2: [B,128] @ [128,128] + b2, ReLU.
    h2 = jnp.maximum(
        jnp.dot(h1, w_ref[8:136, :], preferred_element_type=jnp.float32)
        + w_ref[136:137, :],
        0.0,
    )                                                                 # [B, 128]

    # Layer 3 uses the zero-padded [128,128] w3 / [1,128] b3 -> lane-dense store.
    out = (
        jnp.dot(h2, w_ref[144:272, :], preferred_element_type=jnp.float32)
        + w_ref[272:273, :]
    )
    o_ref[...] = out.astype(o_ref.dtype)                              # [B, 128]


def prepare_params(w1, b1, w2, b2, w3, b3):
    """One-time (outside the hot loop) repacking of the PyTorch-shaped params into a
    single [280,128] f32 slab (sections 8-row aligned, w3/b3 zero-padded to 128 lanes)."""
    H = w2.shape[1]          # 128
    A = w3.shape[1]          # action_size
    f32 = jnp.float32

    sec_w1 = jnp.concatenate(
        [w1.astype(f32), b1.astype(f32), jnp.zeros((3, H), f32)], axis=0
    )                                                                  # [8, 128]
    sec_w2 = w2.astype(f32)                                            # [128, 128]
    sec_b2 = jnp.concatenate(
        [b2.astype(f32), jnp.zeros((7, H), f32)], axis=0
    )                                                                  # [8, 128]
    sec_w3 = jnp.pad(w3.astype(f32), ((0, 0), (0, H - A)))             # [128, 128]
    sec_b3 = jnp.concatenate(
        [jnp.pad(b3.astype(f32), ((0, 0), (0, H - A))), jnp.zeros((7, H), f32)],
        axis=0,
    )                                                                  # [8, 128]

    slab = jnp.concatenate([sec_w1, sec_w2, sec_b2, sec_w3, sec_b3], axis=0)
    assert slab.shape == (SLAB_ROWS, H)
    return slab


def qnet_forward(x, slab, action_size):
    """x: [B,4] f32, slab: [280,128] f32, action_size: static Python int."""
    B = x.shape[0]
    H = slab.shape[1]

    flops = 2 * (B * 4 * H + B * H * H + B * H * H)
    bytes_accessed = 4 * (x.size + slab.size + B * H)

    full = lambda shape: pl.BlockSpec(shape, lambda: (0,) * len(shape))

    out = pl.pallas_call(
        qnet_kernel,
        out_shape=jax.ShapeDtypeStruct((B, H), jnp.float32),
        in_specs=[full(x.shape), full(slab.shape)],
        out_specs=full((B, H)),
        cost_estimate=pl.CostEstimate(
            flops=flops, transcendentals=0, bytes_accessed=bytes_accessed
        ),
    )(x, slab)

    # Lane-dense [B,128] store in the kernel; static slice back to the logical A dim.
    return out[:, :action_size]


def init_params(key, action_size):
    """Deterministic init matching the nn.Linear shapes (stored as [in, out])."""
    ks = jax.random.split(key, 6)

    def lin(kw, kb, fan_in, fan_out):
        bound = 1.0 / jnp.sqrt(jnp.float32(fan_in))
        w = jax.random.uniform(kw, (fan_in, fan_out), jnp.float32, -bound, bound)
        b = jax.random.uniform(kb, (1, fan_out), jnp.float32, -bound, bound)
        return w, b

    w1, b1 = lin(ks[0], ks[1], 4, 128)
    w2, b2 = lin(ks[2], ks[3], 128, 128)
    w3, b3 = lin(ks[4], ks[5], 128, action_size)
    return w1, b1, w2, b2, w3, b3


def qnet_reference(x, w1, b1, w2, b2, w3, b3):
    h1 = jnp.maximum(x @ w1 + b1, 0.0)
    h2 = jnp.maximum(h1 @ w2 + b2, 0.0)
    return h2 @ w3 + b3


if __name__ == "__main__":
    key = jax.random.PRNGKey(0)
    k_x, k_p = jax.random.split(key)

    batch = 8
    action_size = 2  # e.g. CartPole

    x = jax.random.normal(k_x, (batch, 4), jnp.float32)
    params = init_params(k_p, action_size)

    # Repack weights once (bias + weight slab packing, lane padding) outside the hot path.
    slab = prepare_params(*params)

    # action_size is static so the final slice has static bounds.
    fwd = jax.jit(functools.partial(qnet_forward), static_argnums=(2,))
    out = fwd(x, slab, action_size)
    out = jax.block_until_ready(out)

    ref = qnet_reference(x, *params)
    assert out.shape == (batch, action_size)
    assert jnp.allclose(out, ref, atol=1e-5, rtol=1e-5), "mismatch vs reference"

    print("KERNEL_OK")
</pallas_src>

<mosaic_0001>
module attributes {stable_mosaic.version = 11 : i64} {
  func.func @qnet_kernel(%arg0: memref<8x4xf32, #tpu.memory_space<vmem>>, %arg1: memref<280x128xf32, #tpu.memory_space<vmem>>, %arg2: memref<8x128xf32, #tpu.memory_space<vmem>>) attributes {dimension_semantics = [], scalar_prefetch = 0 : i64, scratch_operands = 0 : i64, tpu.core_type = #tpu.core_type<tc>} {
    %c0 = arith.constant 0 : index
    %c0_0 = arith.constant 0 : index
    %0 = vector.load %arg0[%c0, %c0_0] : memref<8x4xf32, #tpu.memory_space<vmem>>, vector<8x4xf32>
    %c0_1 = arith.constant 0 : index
    %c0_2 = arith.constant 0 : index
    %1 = vector.load %arg1[%c0_1, %c0_2] : memref<280x128xf32, #tpu.memory_space<vmem>>, vector<4x128xf32>
    %cst = arith.constant dense<0.000000e+00> : vector<8x128xf32>
    %2 = tpu.matmul %0, %1, %cst {dimension_numbers = #tpu.dot_dimension_numbers<[1], [0], [0], [1], [0, 0, 1, 1], [], []>} : vector<8x4xf32>, vector<4x128xf32>, vector<8x128xf32> -> vector<8x128xf32>
    %c4 = arith.constant 4 : index
    %c0_3 = arith.constant 0 : index
    %3 = vector.load %arg1[%c4, %c0_3] : memref<280x128xf32, #tpu.memory_space<vmem>>, vector<1x128xf32>
    %4 = vector.broadcast %3 : vector<1x128xf32> to vector<8x128xf32>
    %5 = arith.addf %2, %4 : vector<8x128xf32>
    %cst_4 = arith.constant 0.000000e+00 : f32
    %6 = vector.broadcast %cst_4 : f32 to vector<8x128xf32>
    %7 = arith.maximumf %5, %6 : vector<8x128xf32>
    %c8 = arith.constant 8 : index
    %c0_5 = arith.constant 0 : index
    %8 = vector.load %arg1[%c8, %c0_5] : memref<280x128xf32, #tpu.memory_space<vmem>>, vector<128x128xf32>
    %cst_6 = arith.constant dense<0.000000e+00> : vector<8x128xf32>
    %9 = tpu.matmul %7, %8, %cst_6 {dimension_numbers = #tpu.dot_dimension_numbers<[1], [0], [0], [1], [0, 0, 1, 1], [], []>} : vector<8x128xf32>, vector<128x128xf32>, vector<8x128xf32> -> vector<8x128xf32>
    %c136 = arith.constant 136 : index
    %c0_7 = arith.constant 0 : index
    %10 = vector.load %arg1[%c136, %c0_7] : memref<280x128xf32, #tpu.memory_space<vmem>>, vector<1x128xf32>
    %11 = vector.broadcast %10 : vector<1x128xf32> to vector<8x128xf32>
    %12 = arith.addf %9, %11 : vector<8x128xf32>
    %cst_8 = arith.constant 0.000000e+00 : f32
    %13 = vector.broadcast %cst_8 : f32 to vector<8x128xf32>
    %14 = arith.maximumf %12, %13 : vector<8x128xf32>
    %c144 = arith.constant 144 : index
    %c0_9 = arith.constant 0 : index
    %15 = vector.load %arg1[%c144, %c0_9] : memref<280x128xf32, #tpu.memory_space<vmem>>, vector<128x128xf32>
    %cst_10 = arith.constant dense<0.000000e+00> : vector<8x128xf32>
    %16 = tpu.matmul %14, %15, %cst_10 {dimension_numbers = #tpu.dot_dimension_numbers<[1], [0], [0], [1], [0, 0, 1, 1], [], []>} : vector<8x128xf32>, vector<128x128xf32>, vector<8x128xf32> -> vector<8x128xf32>
    %c272 = arith.constant 272 : index
    %c0_11 = arith.constant 0 : index
    %17 = vector.load %arg1[%c272, %c0_11] : memref<280x128xf32, #tpu.memory_space<vmem>>, vector<1x128xf32>
    %18 = vector.broadcast %17 : vector<1x128xf32> to vector<8x128xf32>
    %19 = arith.addf %16, %18 : vector<8x128xf32>
    %c0_12 = arith.constant 0 : index
    %c0_13 = arith.constant 0 : index
    %20 = vector.load %arg2[%c0_12, %c0_13] : memref<8x128xf32, #tpu.memory_space<vmem>>, vector<8x128xf32>
    tpu.vector_store %arg2[%c0_12, %c0_13], %19 {strides = array<i32>} : memref<8x128xf32, #tpu.memory_space<vmem>>, vector<8x128xf32>,
    return
  }
}

</mosaic_0001>

<bundles_post_ra>
// kernel: qnet_forward.1
= control target key start
LH: loop header
LB: loop body
LE: loop exit
PB: predicated region body
PF: predicated region fallthrough
CT: control target
= control target key end

     0   :  { %7 = vsyncpa [#allocation3], 0  ;;  %s443_s9 = smov [#allocation2]   ;;  %s511_s0 = inlined_call_operand.vmem [shape: f32[8,4], index: 0, kind: input, shape index: {}]   ;;  %s512_s1 = inlined_call_operand.hbm [shape: f32[280,128], index: 1, kind: input, shape index: {}]   ;;  %s513_s2 = inlined_call_operand.vmem [shape: f32[8,128], index: 2, kind: output, shape index: {}]  }
   0x1   :  { %s15_s10 = sshll.u32 %s443_s9, 4  ;;  %s16_s10 = int_to_ptr.vmem [resolvable:$true] %s15_s10 }
   0x2   :  { %s429_s11 = scalar_lea.vmem %s16_s10, 4480  ;;  %p434_p1 = scmp.lt.s32.totalorder %s16_s10, %s16_s10 }
   0x3   :  { %p430_p0 = scmp.ne.s32.totalorder %s16_s10, %s429_s11  ;;  %p435_p2 = scmp.lt.s32.totalorder %s429_s11, %s429_s11 }
   0x5   :  { %p436_p3 = por %p435_p2, %p434_p1 }
   0x7   :  { %p437_p4 = pnand %p436_p3, %p430_p0 }
   0x9   :  { %440 = shalt.err (!%p437_p4)
}
   0xa   :  { %s444_s12 = smov 128   ;;  %s445_s13 = smov 8  }
   0xb   :  { %21 = dma.hbm_to_vmem [thread:$0]  %s512_s1, 4480, %s16_s10, [#allocation3], %s444_s12, %s444_s12, %s445_s13  }
   0xc   :  { %441 = dma.done.wait [#allocation3], 4480  }
   0xd   :  { %442 = vsyncadd [#allocation3], 4294962816  ;;  %v446_v0 = vmov 0.0   ;;  %vm447_vm0 = vmmov 0   ;;  %vm36_vm1 = vcmask 1043456   ;;  %vm32_vm2 = vcmask 31744  }
   0xe   :  { %341 = vmatprep.subr.mxu0 %v446_v0  ;;  %343 = vmatprep.mubr.msk.f32.mxu0 %vm447_vm0, %v446_v0  ;;  %v26_v1 = vld [vmem:[#allocation2] sm:$0xf]  ;;  %v125_v4 = vld [vmem:[#allocation2 + $0x78] sm:$0xff]  ;;  %v124_v5 = vld [vmem:[#allocation2 + $0x70] sm:$0xff] }
   0xf   :  { %346 = vmatprep.subr.mxu1 %v446_v0  ;;  %378 = vmatprep.mubr.msk.f32.mxu1 %vm447_vm0, %v446_v0  ;;  %v25_v2 = vld [vmem:[%s511_s0] sm:$0xff]  ;;  %v123_v6 = vld [vmem:[#allocation2 + $0x68] sm:$0xff]  ;;  %v121_v8 = vld [vmem:[#allocation2 + $0x58] sm:$0xff] }
  0x10   :  { %v126_v3 = vld [vmem:[#allocation2 + $0x80] sm:$0xff]  ;;  %342 = vmatpush3.msk.msra.mxu0 %vm36_vm1, %v26_v1  ;;  %v120_v9 = vld [vmem:[#allocation2 + $0x50] sm:$0xff]  ;;  %v119_v10 = vld [vmem:[#allocation2 + $0x48] sm:$0xff] }
  0x11   :  { %347 = vmatpush3.msra.mxu1 %v126_v3  ;;  %344 = vmatmul.mubr.msk.f32.vlgmr.msra.gmra.mxu0 %vm32_vm2, %v25_v2  ;;  %v122_v7 = vld [vmem:[#allocation2 + $0x60] sm:$0xff]  ;;  %v117_v12 = vld [vmem:[#allocation2 + $0x38] sm:$0xff]  ;;  %v116_v13 = vld [vmem:[#allocation2 + $0x30] sm:$0xff] }
  0x12   :  { %348 = vmatprep.subr.mxu1 %v446_v0  ;;  %381 = vmatprep.subr.mxu0 %v446_v0  ;;  %v118_v11 = vld [vmem:[#allocation2 + $0x40] sm:$0xff]  ;;  %v115_v14 = vld [vmem:[#allocation2 + $0x28] sm:$0xff]  ;;  %v113_v16 = vld [vmem:[#allocation2 + $0x18] sm:$0xff] }
  0x13   :  { %349 = vmatpush3.msra.mxu1 %v125_v4  ;;  %413 = vmatprep.mubr.msk.f32.mxu0 %vm447_vm0, %v446_v0  ;;  %v114_v15 = vld [vmem:[#allocation2 + $0x20] sm:$0xff]  ;;  %v112_v17 = vld [vmem:[#allocation2 + $0x10] sm:$0xff]  ;;  %v111_v18 = vld [vmem:[#allocation2 + $0x8] sm:$0xff] }
  0x14   :  { %350 = vmatprep.subr.mxu1 %v446_v0  ;;  %v218_v19 = vld [vmem:[#allocation2 + $0x108] sm:$0xff]  ;;  %v217_v20 = vld [vmem:[#allocation2 + $0x100] sm:$0xff]  ;;  %v216_v21 = vld [vmem:[#allocation2 + $0xf8] sm:$0xff] }
  0x15   :  { %351 = vmatpush3.msra.mxu1 %v124_v5  ;;  %382 = vmatpush3.msra.mxu0 %v218_v19  ;;  %v215_v22 = vld [vmem:[#allocation2 + $0xf0] sm:$0xff]  ;;  %v214_v23 = vld [vmem:[#allocation2 + $0xe8] sm:$0xff]  ;;  %v213_v24 = vld [vmem:[#allocation2 + $0xe0] sm:$0xff] }
  0x16   :  { %352 = vmatprep.subr.mxu1 %v446_v0  ;;  %383 = vmatprep.subr.mxu0 %v446_v0  ;;  %v212_v25 = vld [vmem:[#allocation2 + $0xd8] sm:$0xff]  ;;  %v211_v26 = vld [vmem:[#allocation2 + $0xd0] sm:$0xff]  ;;  %v210_v27 = vld [vmem:[#allocation2 + $0xc8] sm:$0xff] }
  0x17   :  { %353 = vmatpush3.msra.mxu1 %v123_v6  ;;  %384 = vmatpush3.msra.mxu0 %v217_v20  ;;  %v209_v28 = vld [vmem:[#allocation2 + $0xc0] sm:$0xff]  ;;  %v208_v29 = vld [vmem:[#allocation2 + $0xb8] sm:$0xff]  ;;  %v207_v30 = vld [vmem:[#allocation2 + $0xb0] sm:$0xff] }
  0x18   :  { %354 = vmatprep.subr.mxu1 %v446_v0  ;;  %385 = vmatprep.subr.mxu0 %v446_v0  ;;  %v206_v31 = vld [vmem:[#allocation2 + $0xa8] sm:$0xff]  ;;  %v300_v32 = vld [vmem:[#allocation2 + $0x4] ss:$0 sm:$0xff]  ;;  %v204_v38 = vld [vmem:[#allocation2 + $0x98] sm:$0xff] }
  0x19   :  { %355 = vmatpush3.msra.mxu1 %v122_v7  ;;  %386 = vmatpush3.msra.mxu0 %v216_v21  ;;  %v205_v37 = vld [vmem:[#allocation2 + $0xa0] sm:$0xff]  ;;  %v203_v39 = vld [vmem:[#allocation2 + $0x90] sm:$0xff]  ;;  %v303_v40 = vld [vmem:[#allocation2 + $0x88] ss:$0 sm:$0xff] }
  0x1a   :  { %356 = vmatprep.subr.mxu1 %v446_v0  ;;  %387 = vmatprep.subr.mxu0 %v446_v0  ;;  %v304_v45 = vld [vmem:[#allocation2 + $0x110] ss:$0 sm:$0xff] }
  0x1b   :  { %357 = vmatpush3.msra.mxu1 %v121_v8  ;;  %388 = vmatpush3.msra.mxu0 %v215_v22 }
  0x1c   :  { %358 = vmatprep.subr.mxu1 %v446_v0  ;;  %389 = vmatprep.subr.mxu0 %v446_v0 }
  0x1d   :  { %359 = vmatpush3.msra.mxu1 %v120_v9  ;;  %390 = vmatpush3.msra.mxu0 %v214_v23 }
  0x1e   :  { %360 = vmatprep.subr.mxu1 %v446_v0  ;;  %391 = vmatprep.subr.mxu0 %v446_v0 }
  0x1f   :  { %361 = vmatpush3.msra.mxu1 %v119_v10  ;;  %392 = vmatpush3.msra.mxu0 %v213_v24 }
  0x20   :  { %362 = vmatprep.subr.mxu1 %v446_v0  ;;  %393 = vmatprep.subr.mxu0 %v446_v0 }
  0x21   :  { %363 = vmatpush3.msra.mxu1 %v118_v11  ;;  %394 = vmatpush3.msra.mxu0 %v212_v25 }
  0x22   :  { %364 = vmatprep.subr.mxu1 %v446_v0  ;;  %395 = vmatprep.subr.mxu0 %v446_v0 }
  0x23   :  { %365 = vmatpush3.msra.mxu1 %v117_v12  ;;  %396 = vmatpush3.msra.mxu0 %v211_v26 }
  0x24   :  { %366 = vmatprep.subr.mxu1 %v446_v0  ;;  %397 = vmatprep.subr.mxu0 %v446_v0 }
  0x25   :  { %367 = vmatpush3.msra.mxu1 %v116_v13  ;;  %398 = vmatpush3.msra.mxu0 %v210_v27 }
  0x26   :  { %368 = vmatprep.subr.mxu1 %v446_v0  ;;  %399 = vmatprep.subr.mxu0 %v446_v0 }
  0x27   :  { %369 = vmatpush3.msra.mxu1 %v115_v14  ;;  %400 = vmatpush3.msra.mxu0 %v209_v28 }
  0x28   :  { %370 = vmatprep.subr.mxu1 %v446_v0  ;;  %401 = vmatprep.subr.mxu0 %v446_v0 }
  0x29   :  { %371 = vmatpush3.msra.mxu1 %v114_v15  ;;  %402 = vmatpush3.msra.mxu0 %v208_v29 }
  0x2a   :  { %372 = vmatprep.subr.mxu1 %v446_v0  ;;  %403 = vmatprep.subr.mxu0 %v446_v0 }
  0x2b   :  { %373 = vmatpush3.msra.mxu1 %v113_v16  ;;  %404 = vmatpush3.msra.mxu0 %v207_v30 }
  0x2c   :  { %374 = vmatprep.subr.mxu1 %v446_v0  ;;  %405 = vmatprep.subr.mxu0 %v446_v0 }
  0x2d   :  { %375 = vmatpush3.msra.mxu1 %v112_v17  ;;  %406 = vmatpush3.msra.mxu0 %v206_v31 }
  0x2e   :  { %376 = vmatprep.subr.mxu1 %v446_v0  ;;  %407 = vmatprep.subr.mxu0 %v446_v0 }
  0x2f   :  { %377 = vmatpush3.msra.mxu1 %v111_v18  ;;  %408 = vmatpush3.msra.mxu0 %v205_v37 }
  0x30   :  { %409 = vmatprep.subr.mxu0 %v446_v0 }
  0x31   :  { %410 = vmatpush3.msra.mxu0 %v204_v38 }
  0x32   :  { %411 = vmatprep.subr.mxu0 %v446_v0 }
  0x33   :  { %412 = vmatpush3.msra.mxu0 %v203_v39 }
  0xd1   :  { %v106_v33 = vpop.f32.mrf.mxu0 }
  0xd2   :  { %v107_v34 = vadd.f32 %v300_v32, %v106_v33 }
  0xd3   :  { %v345_v35 = vpop.f32.mrf.mxu0 }
  0xd4   :  { %v110_v36 = vmax.f32 %v107_v34, 0.0 }
  0xd6   :  { %379 = vmatmul.mubr.f32.vlgmr.msra.gmra.mxu1 %v110_v36 }
 0x196   :  { %v198_v41 = vpop.f32.mrf.mxu1 }
 0x197   :  { %v199_v42 = vadd.f32 %v303_v40, %v198_v41 }
 0x198   :  { %v380_v43 = vpop.f32.mrf.mxu1 }
 0x199   :  { %v202_v44 = vmax.f32 %v199_v42, 0.0 }
 0x19b   :  { %414 = vmatmul.mubr.f32.vlgmr.msra.gmra.mxu0 %v202_v44 }
 0x25b   :  { %v290_v46 = vpop.f32.mrf.mxu0 }
 0x25c   :  { %v291_v47 = vadd.f32 %v304_v45, %v290_v46 }
 0x25d   :  { %v415_v48 = vpop.f32.mrf.mxu0 }
 0x25e   :  { %294 = vst [vmem:[%s513_s2] sm:$0xff] %v291_v47 }
 0x25f   :  { %299 = vsyncpa [#allocation3], 1 }

</bundles_post_ra>
